<compile_context>
chip_gen: v5e
topology: v5e:2x2
jax: 0.10.0
libtpu: 0.0.40
codegen_flags: <defaults>
</compile_context>

<pallas_src>
import math

import jax
import jax.numpy as jnp
from jax.experimental import pallas as pl
from jax.experimental.pallas import tpu as pltpu


def _round_up(x, m):
    return ((x + m - 1) // m) * m


def _sublanes(itemsize):
    # fp32 -> 8, bf16 -> 16, int8 -> 32 (packed sub-32-bit dtypes stack sublanes).
    return 8 * max(1, 4 // int(itemsize))


def _tile_vmem_bytes(rows, cols, dtype):
    it = jnp.dtype(dtype).itemsize
    return _round_up(max(rows, 1), _sublanes(it)) * _round_up(max(cols, 1), 128) * it


def rel_position_fusion(pos_list, weight, bias, *, tm_rows=8192, out_dtype=None):
    """pos_list: list of num_pos arrays [B, S, S, dim_pos].
    weight: [K, N] with K = dim_pos * num_pos (transpose of torch's [out, in]).
    bias: [N].  Returns [B, S, S, N] = relu(concat(pos, -1) @ weight + bias)."""
    num_pos = len(pos_list)
    B, S1, S2, dp = pos_list[0].shape
    K, N = weight.shape
    assert K == dp * num_pos, "weight K must equal dim_pos * num_pos"

    M = B * S1 * S2
    in_dtype = pos_list[0].dtype
    out_dtype = out_dtype or in_dtype

    # ---- lane-packing factor: make the packed input last dim a multiple of 128.
    pf = 128 // math.gcd(dp, 128)
    if pf > 16:  # pathological dim_pos (e.g. odd): fall back to the unpacked layout
        pf = 1
    dpp = dp * pf          # packed per-slab K (multiple of 128 when pf > 1)
    Npf = N * pf           # packed output width

    # ---- free reshapes (contiguous, channels-last) + zero-pad tail to pf rows.
    xs = [p.reshape(M, dp) for p in pos_list]
    M_pad = _round_up(M, pf)
    if M_pad != M:
        xs = [jnp.pad(x, ((0, M_pad - M), (0, 0))) for x in xs]
    Mp = M_pad // pf
    xs = [x.reshape(Mp, dpp) for x in xs]

    # ---- block-diagonal weight expansion (host-side, tiny) + tiled bias.
    w = weight.astype(in_dtype)
    if pf > 1:
        eye = jnp.eye(pf, dtype=w.dtype)
        w_packed = jnp.concatenate(
            [jnp.kron(eye, w[p * dp:(p + 1) * dp, :]) for p in range(num_pos)], axis=0
        )                                           # [num_pos*dpp, Npf]
        b_packed = jnp.tile(bias.astype(jnp.float32), pf)
    else:
        w_packed = w                                # [K, N]
        b_packed = bias.astype(jnp.float32)
    b_packed = b_packed.reshape(1, Npf)

    # ---- row-tile selection on the *packed* rows, sized from the lane-padded
    #      VMEM footprint (double-buffered inputs/outputs + resident weight/bias).
    sl = max(_sublanes(jnp.dtype(in_dtype).itemsize),
             _sublanes(jnp.dtype(out_dtype).itemsize))
    tm_p = max(sl, ((tm_rows // pf) // sl) * sl)
    tm_p = min(tm_p, _round_up(Mp, sl))

    def footprint(t):
        return (2 * num_pos * _tile_vmem_bytes(t, dpp, in_dtype)
                + 2 * _tile_vmem_bytes(t, Npf, out_dtype)
                + 2 * _tile_vmem_bytes(num_pos * dpp, Npf, w_packed.dtype)
                + 2 * _tile_vmem_bytes(1, Npf, jnp.float32))

    VMEM_BUDGET = 40 << 20   # per-core; safe on v7x (64 MiB) and v5e/v6e (128 MiB)
    while tm_p > sl and footprint(tm_p) > VMEM_BUDGET:
        tm_p = max(sl, ((tm_p // 2) // sl) * sl)

    # Explicit scoped-VMEM override (v5e default is only 16 MiB); cap below 64 MiB
    # to leave headroom for Mosaic internal scratch (review: 48-56 MiB on v7x).
    vmem_limit = int(min(max(footprint(tm_p) + (8 << 20), 16 << 20), 48 << 20))

    grid = (pl.cdiv(Mp, tm_p),)   # last tile may be partial -> masked writes

    def kernel(*refs):
        x_refs = refs[:num_pos]
        w_ref, b_ref, o_ref = refs[num_pos], refs[num_pos + 1], refs[num_pos + 2]
        # Fused concat: accumulate per-slab lane-dense dots in fp32 on the MXU.
        acc = jnp.dot(x_refs[0][...], w_ref[pl.ds(0, dpp), :],
                      preferred_element_type=jnp.float32)
        for p in range(1, num_pos):
            acc = acc + jnp.dot(x_refs[p][...], w_ref[pl.ds(p * dpp, dpp), :],
                                preferred_element_type=jnp.float32)
        acc = acc + b_ref[...]                      # bias kept in f32 (v5e VPU: no bf16)
        o_ref[...] = jnp.maximum(acc, 0.0).astype(o_ref.dtype)

    in_specs = [pl.BlockSpec((tm_p, dpp), lambda i: (i, 0)) for _ in range(num_pos)]
    in_specs += [
        pl.BlockSpec((num_pos * dpp, Npf), lambda i: (0, 0)),  # weight resident
        pl.BlockSpec((1, Npf), lambda i: (0, 0)),              # bias resident
    ]
    out_spec = pl.BlockSpec((tm_p, Npf), lambda i: (i, 0))

    out = pl.pallas_call(
        kernel,
        out_shape=jax.ShapeDtypeStruct((Mp, Npf), out_dtype),
        grid_spec=pltpu.PrefetchScalarGridSpec(
            num_scalar_prefetch=0,
            grid=grid,
            in_specs=in_specs,
            out_specs=out_spec,
        ),
        compiler_params=pltpu.CompilerParams(
            dimension_semantics=("parallel",),     # megacore split on v7x
            vmem_limit_bytes=vmem_limit,
        ),
    )(*xs, w_packed, b_packed)

    out = out.reshape(M_pad, N)                    # free un-packing reshape
    if M_pad != M:
        out = out[:M]                              # drop zero-padded tail rows
    return out.reshape(B, S1, S2, N)


def rel_position_fusion_ref(pos_list, weight, bias):
    pe4 = jnp.concatenate(pos_list, axis=-1)
    return jnp.maximum(jnp.einsum("bqkd,dn->bqkn", pe4, weight) + bias, 0.0)


if __name__ == "__main__":
    # config: dim_pos=16, num_pos=4, hidden_size=32, batch=2, seq=8
    dim_pos, num_pos, hidden = 16, 4, 32
    B, S = 2, 8
    K = dim_pos * num_pos

    key = jax.random.PRNGKey(0)
    k_pos, k_w, k_b = jax.random.split(key, 3)

    # deterministic synthetic inputs: num_pos relative-position embeddings
    pos_keys = jax.random.split(k_pos, num_pos)
    pos_list = [
        jax.random.normal(pk, (B, S, S, dim_pos), dtype=jnp.float32)
        for pk in pos_keys
    ]

    # deterministic Linear params (PyTorch-style uniform(-1/sqrt(K), 1/sqrt(K))),
    # stored transposed as [K, N]
    bound = 1.0 / jnp.sqrt(jnp.float32(K))
    weight = jax.random.uniform(k_w, (K, hidden), jnp.float32, -bound, bound)
    bias = jax.random.uniform(k_b, (hidden,), jnp.float32, -bound, bound)

    ref = rel_position_fusion_ref(pos_list, weight, bias)

    # 1) fp32 path (lane-packed, pf=8 -> 128/256-lane tiles)
    out = jax.block_until_ready(rel_position_fusion(pos_list, weight, bias))
    assert out.shape == (B, S, S, hidden)
    assert jnp.allclose(out, ref, atol=1e-5, rtol=1e-5)

    # 2) non-divisible-M / zero-padded-tail path (B=1, S=5 -> M=25, padded to 32)
    pos_list_odd = [
        jax.random.normal(pk, (1, 5, 5, dim_pos), dtype=jnp.float32)
        for pk in jax.random.split(k_pos, num_pos)
    ]
    out_odd = jax.block_until_ready(rel_position_fusion(pos_list_odd, weight, bias))
    ref_odd = rel_position_fusion_ref(pos_list_odd, weight, bias)
    assert out_odd.shape == (1, 5, 5, hidden)
    assert jnp.allclose(out_odd, ref_odd, atol=1e-5, rtol=1e-5)

    # 3) bf16 fast path (halves HBM traffic; fp32 accumulation inside the kernel)
    pos_bf16 = [p.astype(jnp.bfloat16) for p in pos_list]
    out_bf16 = jax.block_until_ready(
        rel_position_fusion(pos_bf16, weight.astype(jnp.bfloat16), bias,
                            out_dtype=jnp.bfloat16))
    assert out_bf16.shape == (B, S, S, hidden)
    assert jnp.allclose(out_bf16.astype(jnp.float32), ref, atol=5e-2, rtol=5e-2)

    print("KERNEL_OK")
</pallas_src>

<mosaic_0001>
module attributes {stable_mosaic.version = 11 : i64} {
  func.func @kernel(%arg0: i32, %arg1: memref<16x128xf32, #tpu.memory_space<vmem>>, %arg2: memref<16x128xf32, #tpu.memory_space<vmem>>, %arg3: memref<16x128xf32, #tpu.memory_space<vmem>>, %arg4: memref<16x128xf32, #tpu.memory_space<vmem>>, %arg5: memref<512x256xf32, #tpu.memory_space<vmem>>, %arg6: memref<1x256xf32, #tpu.memory_space<vmem>>, %arg7: memref<16x256xf32, #tpu.memory_space<vmem>>) attributes {dimension_semantics = [#tpu.dimension_semantics<parallel>], iteration_bounds = array<i64: 1>, scalar_prefetch = 0 : i64, scratch_operands = 0 : i64, tpu.core_type = #tpu.core_type<tc>, window_params = [{transform_indices = @transform_0, window_bounds = array<i64: 16, 128>}, {transform_indices = @transform_1, window_bounds = array<i64: 16, 128>}, {transform_indices = @transform_2, window_bounds = array<i64: 16, 128>}, {transform_indices = @transform_3, window_bounds = array<i64: 16, 128>}, {pipeline_mode = #tpu.pipeline_mode<synchronous>, transform_indices = @transform_4, window_bounds = array<i64: 512, 256>}, {pipeline_mode = #tpu.pipeline_mode<synchronous>, transform_indices = @transform_5, window_bounds = array<i64: 1, 256>}, {transform_indices = @transform_6, window_bounds = array<i64: 16, 256>}]} {
    %c0 = arith.constant 0 : index
    %c0_0 = arith.constant 0 : index
    %0 = vector.load %arg1[%c0, %c0_0] : memref<16x128xf32, #tpu.memory_space<vmem>>, vector<16x128xf32>
    %c0_1 = arith.constant 0 : index
    %c0_2 = arith.constant 0 : index
    %1 = vector.load %arg5[%c0_1, %c0_2] : memref<512x256xf32, #tpu.memory_space<vmem>>, vector<128x256xf32>
    %cst = arith.constant dense<0.000000e+00> : vector<16x256xf32>
    %2 = tpu.matmul %0, %1, %cst {dimension_numbers = #tpu.dot_dimension_numbers<[1], [0], [0], [1], [0, 0, 1, 1], [], []>} : vector<16x128xf32>, vector<128x256xf32>, vector<16x256xf32> -> vector<16x256xf32>
    %c0_3 = arith.constant 0 : index
    %c0_4 = arith.constant 0 : index
    %3 = vector.load %arg2[%c0_3, %c0_4] : memref<16x128xf32, #tpu.memory_space<vmem>>, vector<16x128xf32>
    %c128 = arith.constant 128 : index
    %c0_5 = arith.constant 0 : index
    %4 = vector.load %arg5[%c128, %c0_5] : memref<512x256xf32, #tpu.memory_space<vmem>>, vector<128x256xf32>
    %cst_6 = arith.constant dense<0.000000e+00> : vector<16x256xf32>
    %5 = tpu.matmul %3, %4, %cst_6 {dimension_numbers = #tpu.dot_dimension_numbers<[1], [0], [0], [1], [0, 0, 1, 1], [], []>} : vector<16x128xf32>, vector<128x256xf32>, vector<16x256xf32> -> vector<16x256xf32>
    %6 = arith.addf %2, %5 : vector<16x256xf32>
    %c0_7 = arith.constant 0 : index
    %c0_8 = arith.constant 0 : index
    %7 = vector.load %arg3[%c0_7, %c0_8] : memref<16x128xf32, #tpu.memory_space<vmem>>, vector<16x128xf32>
    %c256 = arith.constant 256 : index
    %c0_9 = arith.constant 0 : index
    %8 = vector.load %arg5[%c256, %c0_9] : memref<512x256xf32, #tpu.memory_space<vmem>>, vector<128x256xf32>
    %cst_10 = arith.constant dense<0.000000e+00> : vector<16x256xf32>
    %9 = tpu.matmul %7, %8, %cst_10 {dimension_numbers = #tpu.dot_dimension_numbers<[1], [0], [0], [1], [0, 0, 1, 1], [], []>} : vector<16x128xf32>, vector<128x256xf32>, vector<16x256xf32> -> vector<16x256xf32>
    %10 = arith.addf %6, %9 : vector<16x256xf32>
    %c0_11 = arith.constant 0 : index
    %c0_12 = arith.constant 0 : index
    %11 = vector.load %arg4[%c0_11, %c0_12] : memref<16x128xf32, #tpu.memory_space<vmem>>, vector<16x128xf32>
    %c384 = arith.constant 384 : index
    %c0_13 = arith.constant 0 : index
    %12 = vector.load %arg5[%c384, %c0_13] : memref<512x256xf32, #tpu.memory_space<vmem>>, vector<128x256xf32>
    %cst_14 = arith.constant dense<0.000000e+00> : vector<16x256xf32>
    %13 = tpu.matmul %11, %12, %cst_14 {dimension_numbers = #tpu.dot_dimension_numbers<[1], [0], [0], [1], [0, 0, 1, 1], [], []>} : vector<16x128xf32>, vector<128x256xf32>, vector<16x256xf32> -> vector<16x256xf32>
    %14 = arith.addf %10, %13 : vector<16x256xf32>
    %c0_15 = arith.constant 0 : index
    %c0_16 = arith.constant 0 : index
    %15 = vector.load %arg6[%c0_15, %c0_16] : memref<1x256xf32, #tpu.memory_space<vmem>>, vector<1x256xf32>
    %16 = vector.broadcast %15 : vector<1x256xf32> to vector<16x256xf32>
    %17 = arith.addf %14, %16 : vector<16x256xf32>
    %cst_17 = arith.constant 0.000000e+00 : f32
    %18 = vector.broadcast %cst_17 : f32 to vector<16x256xf32>
    %19 = arith.maximumf %17, %18 : vector<16x256xf32>
    %c0_18 = arith.constant 0 : index
    %c0_19 = arith.constant 0 : index
    %20 = vector.load %arg7[%c0_18, %c0_19] : memref<16x256xf32, #tpu.memory_space<vmem>>, vector<16x256xf32>
    tpu.vector_store %arg7[%c0_18, %c0_19], %19 {strides = array<i32>} : memref<16x256xf32, #tpu.memory_space<vmem>>, vector<16x256xf32>,
    return
  }
  func.func @transform_0(%arg0: i32) -> (i32, i32) {
    %c0_i32 = arith.constant 0 : i32
    %c0_i32_0 = arith.constant 0 : i32
    return %arg0, %c0_i32 : i32, i32
  }
  func.func @transform_1(%arg0: i32) -> (i32, i32) {
    %c0_i32 = arith.constant 0 : i32
    %c0_i32_0 = arith.constant 0 : i32
    return %arg0, %c0_i32 : i32, i32
  }
  func.func @transform_2(%arg0: i32) -> (i32, i32) {
    %c0_i32 = arith.constant 0 : i32
    %c0_i32_0 = arith.constant 0 : i32
    return %arg0, %c0_i32 : i32, i32
  }
  func.func @transform_3(%arg0: i32) -> (i32, i32) {
    %c0_i32 = arith.constant 0 : i32
    %c0_i32_0 = arith.constant 0 : i32
    return %arg0, %c0_i32 : i32, i32
  }
  func.func @transform_4(%arg0: i32) -> (i32, i32) {
    %c0_i32 = arith.constant 0 : i32
    %c0_i32_0 = arith.constant 0 : i32
    %c0_i32_1 = arith.constant 0 : i32
    return %c0_i32, %c0_i32_0 : i32, i32
  }
  func.func @transform_5(%arg0: i32) -> (i32, i32) {
    %c0_i32 = arith.constant 0 : i32
    %c0_i32_0 = arith.constant 0 : i32
    %c0_i32_1 = arith.constant 0 : i32
    return %c0_i32, %c0_i32_0 : i32, i32
  }
  func.func @transform_6(%arg0: i32) -> (i32, i32) {
    %c0_i32 = arith.constant 0 : i32
    %c0_i32_0 = arith.constant 0 : i32
    return %arg0, %c0_i32 : i32, i32
  }
}

</mosaic_0001>

<bundles_post_ra>
// kernel: tpu_custom_call.1
= control target key start
LH: loop header
LB: loop body
LE: loop exit
PB: predicated region body
PF: predicated region fallthrough
CT: control target
= control target key end

     0   :  { %11 = vsyncpa [#allocation3], 0  ;;  %s703_s0 = inlined_call_operand.hbm [shape: f32[16,128], index: 0, kind: input, shape index: {}]   ;;  %s704_s1 = inlined_call_operand.hbm [shape: f32[16,128], index: 1, kind: input, shape index: {}]   ;;  %s705_s2 = inlined_call_operand.hbm [shape: f32[16,128], index: 2, kind: input, shape index: {}]   ;;  %s706_s3 = inlined_call_operand.hbm [shape: f32[16,128], index: 3, kind: input, shape index: {}]   ;;  %s707_s4 = inlined_call_operand.hbm [shape: f32[512,256], index: 4, kind: input, shape index: {}]   ;;  %s708_s5 = inlined_call_operand.vmem [shape: f32[1,256], index: 5, kind: input, shape index: {}]   ;;  %s709_s6 = inlined_call_operand.hbm [shape: f32[16,256], index: 6, kind: output, shape index: {}]  }
   0x1   :  { %12 = vsyncpa [#allocation6], 0 }
   0x2   :  { %13 = vsyncpa [#allocation9], 0 }
   0x3   :  { %14 = vsyncpa [#allocation4], 0  ;;  %s32_s23 = sshll.u32 %s704_s1, 4  ;;  %s631_s24 = smov [#allocation5]   ;;  %s33_s23 = int_to_ptr.hbm [resolvable:$true] %s32_s23 }
   0x4   :  { %s34_s25 = sshll.u32 %s631_s24, 4  ;;  %s58_s28 = sshll.u32 %s706_s3, 4  ;;  %s35_s25 = int_to_ptr.vmem [resolvable:$true] %s34_s25  ;;  %s59_s28 = int_to_ptr.hbm [resolvable:$true] %s58_s28 }
   0x5   :  { %s632_s29 = smov 128   ;;  %s633_s30 = smov 8  }
   0x6   :  { %40 = dma.hbm_to_vmem [thread:$0]  %s33_s23, 256, %s35_s25, [#allocation6], %s632_s29, %s632_s29, %s633_s30  }
   0x7   :  { %s634_s7 = smov [#allocation8]   ;;  %s19_s11 = sshll.u32 %s703_s0, 4  ;;  %s20_s11 = int_to_ptr.hbm [resolvable:$true] %s19_s11 }
   0x8   :  { %s60_s8 = sshll.u32 %s634_s7, 4  ;;  %s45_s13 = sshll.u32 %s705_s2, 4  ;;  %s61_s8 = int_to_ptr.vmem [resolvable:$true] %s60_s8  ;;  %s46_s13 = int_to_ptr.hbm [resolvable:$true] %s45_s13 }
   0x9   :  { %66 = dma.hbm_to_vmem [thread:$0]  %s59_s28, 256, %s61_s8, [#allocation9], %s632_s29, %s632_s29, %s633_s30  }
   0xa   :  { %s635_s14 = smov [#allocation2]   ;;  %s636_s3 = smov [#allocation7]  }
   0xb   :  { %s21_s15 = sshll.u32 %s635_s14, 4  ;;  %s47_s16 = sshll.u32 %s636_s3, 4  ;;  %s22_s15 = int_to_ptr.vmem [resolvable:$true] %s21_s15  ;;  %s48_s16 = int_to_ptr.vmem [resolvable:$true] %s47_s16 }
   0xc   :  { %27 = dma.hbm_to_vmem [thread:$0]  %s20_s11, 256, %s22_s15, [#allocation3], %s632_s29, %s632_s29, %s633_s30  }
   0xd   :  { %s71_s19 = sshll.u32 %s707_s4, 4  ;;  %s637_s0 = smov [#allocation10]   ;;  %s72_s19 = int_to_ptr.hbm [resolvable:$true] %s71_s19 }
   0xe   :  { %53 = dma.hbm_to_vmem [thread:$0]  %s46_s13, 256, %s48_s16, [#allocation6], %s632_s29, %s632_s29, %s633_s30  }
   0xf   :  { %s73_s20 = sshll.u32 %s637_s0, 4  ;;  %s638_s21 = smov 256   ;;  %s74_s20 = int_to_ptr.vmem [resolvable:$true] %s73_s20 }
  0x10   :  { %s639_s22 = smov 16  }
  0x11   :  { %79 = dma.hbm_to_vmem [thread:$0]  %s72_s19, 16384, %s74_s20, [#allocation9], %s638_s21, %s638_s21, %s639_s22  }
  0x12   :  { %623 = dma.done.wait [#allocation3], 256  }
  0x13   :  { %624 = vsyncadd [#allocation3], 4294967040 }
  0x14   :  { %625 = dma.done.wait [#allocation6], 512  }
  0x15   :  { %626 = vsyncadd [#allocation6], 4294966784 }
  0x16   :  { %627 = dma.done.wait [#allocation9], 16640  }
  0x17   :  { %628 = vsyncadd [#allocation9], 4294950656  ;;  %v168_v0 = vld [vmem:[#allocation10 + $0x1f0] sm:$0xff]  ;;  %v169_v1 = vld [vmem:[#allocation10 + $0x1f8] sm:$0xff]  ;;  %s454_s26 = sshll.u32 %s709_s6, 4  ;;  %s455_s26 = int_to_ptr.hbm [resolvable:$true] %s454_s26 }
  0x18   :  { %v134_v2 = vld [vmem:[#allocation10 + $0xf0] sm:$0xff]  ;;  %170 = vmatpush.msra.mxu0 %v168_v0  ;;  %193 = vmatpush.msra.mxu1 %v169_v1  ;;  %v135_v3 = vld [vmem:[#allocation10 + $0xf8] sm:$0xff]  ;;  %v166_v4 = vld [vmem:[#allocation10 + $0x1e0] sm:$0xff] }
  0x19   :  { %v167_v5 = vld [vmem:[#allocation10 + $0x1e8] sm:$0xff]  ;;  %216 = vmatpush.msra.mxu2 %v134_v2  ;;  %239 = vmatpush.msra.mxu3 %v135_v3  ;;  %v132_v6 = vld [vmem:[#allocation10 + $0xe0] sm:$0xff]  ;;  %v164_v8 = vld [vmem:[#allocation10 + $0x1d0] sm:$0xff] }
  0x1a   :  { %v133_v7 = vld [vmem:[#allocation10 + $0xe8] sm:$0xff]  ;;  %171 = vmatpush.msra.mxu0 %v166_v4  ;;  %194 = vmatpush.msra.mxu1 %v167_v5  ;;  %v165_v9 = vld [vmem:[#allocation10 + $0x1d8] sm:$0xff]  ;;  %v130_v10 = vld [vmem:[#allocation10 + $0xd0] sm:$0xff] }
  0x1b   :  { %v131_v11 = vld [vmem:[#allocation10 + $0xd8] sm:$0xff]  ;;  %217 = vmatpush.msra.mxu2 %v132_v6  ;;  %240 = vmatpush.msra.mxu3 %v133_v7  ;;  %v162_v12 = vld [vmem:[#allocation10 + $0x1c0] sm:$0xff]  ;;  %v163_v13 = vld [vmem:[#allocation10 + $0x1c8] sm:$0xff] }
  0x1c   :  { %172 = vmatpush.msra.mxu0 %v164_v8  ;;  %195 = vmatpush.msra.mxu1 %v165_v9  ;;  %v128_v14 = vld [vmem:[#allocation10 + $0xc0] sm:$0xff]  ;;  %v129_v15 = vld [vmem:[#allocation10 + $0xc8] sm:$0xff]  ;;  %v160_v16 = vld [vmem:[#allocation10 + $0x1b0] sm:$0xff] }
  0x1d   :  { %218 = vmatpush.msra.mxu2 %v130_v10  ;;  %241 = vmatpush.msra.mxu3 %v131_v11  ;;  %v161_v17 = vld [vmem:[#allocation10 + $0x1b8] sm:$0xff]  ;;  %v126_v18 = vld [vmem:[#allocation10 + $0xb0] sm:$0xff]  ;;  %v158_v20 = vld [vmem:[#allocation10 + $0x1a0] sm:$0xff] }
  0x1e   :  { %173 = vmatpush.msra.mxu0 %v162_v12  ;;  %196 = vmatpush.msra.mxu1 %v163_v13  ;;  %v127_v19 = vld [vmem:[#allocation10 + $0xb8] sm:$0xff]  ;;  %v159_v21 = vld [vmem:[#allocation10 + $0x1a8] sm:$0xff]  ;;  %v124_v22 = vld [vmem:[#allocation10 + $0xa0] sm:$0xff] }
  0x1f   :  { %219 = vmatpush.msra.mxu2 %v128_v14  ;;  %242 = vmatpush.msra.mxu3 %v129_v15  ;;  %v125_v23 = vld [vmem:[#allocation10 + $0xa8] sm:$0xff]  ;;  %v156_v24 = vld [vmem:[#allocation10 + $0x190] sm:$0xff]  ;;  %v157_v25 = vld [vmem:[#allocation10 + $0x198] sm:$0xff] }
  0x20   :  { %174 = vmatpush.msra.mxu0 %v160_v16  ;;  %197 = vmatpush.msra.mxu1 %v161_v17  ;;  %v122_v26 = vld [vmem:[#allocation10 + $0x90] sm:$0xff]  ;;  %v123_v27 = vld [vmem:[#allocation10 + $0x98] sm:$0xff]  ;;  %v154_v28 = vld [vmem:[#allocation10 + $0x180] sm:$0xff] }
  0x21   :  { %220 = vmatpush.msra.mxu2 %v126_v18  ;;  %243 = vmatpush.msra.mxu3 %v127_v19  ;;  %v155_v29 = vld [vmem:[#allocation10 + $0x188] sm:$0xff]  ;;  %v120_v30 = vld [vmem:[#allocation10 + $0x80] sm:$0xff]  ;;  %v152_v32 = vld [vmem:[#allocation10 + $0x170] sm:$0xff] }
  0x22   :  { %175 = vmatpush.msra.mxu0 %v158_v20  ;;  %198 = vmatpush.msra.mxu1 %v159_v21  ;;  %v121_v31 = vld [vmem:[#allocation10 + $0x88] sm:$0xff]  ;;  %v153_v33 = vld [vmem:[#allocation10 + $0x178] sm:$0xff]  ;;  %v118_v34 = vld [vmem:[#allocation10 + $0x70] sm:$0xff] }
  0x23   :  { %221 = vmatpush.msra.mxu2 %v124_v22  ;;  %244 = vmatpush.msra.mxu3 %v125_v23  ;;  %v119_v35 = vld [vmem:[#allocation10 + $0x78] sm:$0xff]  ;;  %v150_v36 = vld [vmem:[#allocation10 + $0x160] sm:$0xff]  ;;  %v151_v37 = vld [vmem:[#allocation10 + $0x168] sm:$0xff] }
  0x24   :  { %176 = vmatpush.msra.mxu0 %v156_v24  ;;  %199 = vmatpush.msra.mxu1 %v157_v25  ;;  %v116_v38 = vld [vmem:[#allocation10 + $0x60] sm:$0xff]  ;;  %v117_v39 = vld [vmem:[#allocation10 + $0x68] sm:$0xff]  ;;  %v148_v40 = vld [vmem:[#allocation10 + $0x150] sm:$0xff] }
  0x25   :  { %222 = vmatpush.msra.mxu2 %v122_v26  ;;  %245 = vmatpush.msra.mxu3 %v123_v27  ;;  %v149_v41 = vld [vmem:[#allocation10 + $0x158] sm:$0xff]  ;;  %v114_v42 = vld [vmem:[#allocation10 + $0x50] sm:$0xff]  ;;  %v146_v44 = vld [vmem:[#allocation10 + $0x140] sm:$0xff] }
  0x26   :  { %177 = vmatpush.msra.mxu0 %v154_v28  ;;  %200 = vmatpush.msra.mxu1 %v155_v29  ;;  %v115_v43 = vld [vmem:[#allocation10 + $0x58] sm:$0xff]  ;;  %v147_v45 = vld [vmem:[#allocation10 + $0x148] sm:$0xff]  ;;  %v112_v46 = vld [vmem:[#allocation10 + $0x40] sm:$0xff] }
  0x27   :  { %223 = vmatpush.msra.mxu2 %v120_v30  ;;  %246 = vmatpush.msra.mxu3 %v121_v31  ;;  %v113_v47 = vld [vmem:[#allocation10 + $0x48] sm:$0xff]  ;;  %v144_v48 = vld [vmem:[#allocation10 + $0x130] sm:$0xff]  ;;  %v145_v49 = vld [vmem:[#allocation10 + $0x138] sm:$0xff] }
  0x28   :  { %178 = vmatpush.msra.mxu0 %v152_v32  ;;  %201 = vmatpush.msra.mxu1 %v153_v33  ;;  %v110_v50 = vld [vmem:[#allocation10 + $0x30] sm:$0xff]  ;;  %v111_v51 = vld [vmem:[#allocation10 + $0x38] sm:$0xff]  ;;  %v142_v52 = vld [vmem:[#allocation10 + $0x120] sm:$0xff] }
  0x29   :  { %224 = vmatpush.msra.mxu2 %v118_v34  ;;  %247 = vmatpush.msra.mxu3 %v119_v35  ;;  %v143_v53 = vld [vmem:[#allocation10 + $0x128] sm:$0xff]  ;;  %v108_v54 = vld [vmem:[#allocation10 + $0x20] sm:$0xff]  ;;  %v140_v56 = vld [vmem:[#allocation10 + $0x110] sm:$0xff] }
  0x2a   :  { %179 = vmatpush.msra.mxu0 %v150_v36  ;;  %202 = vmatpush.msra.mxu1 %v151_v37  ;;  %v109_v55 = vld [vmem:[#allocation10 + $0x28] sm:$0xff]  ;;  %v141_v57 = vld [vmem:[#allocation10 + $0x118] sm:$0xff]  ;;  %v106_v58 = vld [vmem:[#allocation10 + $0x10] sm:$0xff] }
  0x2b   :  { %225 = vmatpush.msra.mxu2 %v116_v38  ;;  %248 = vmatpush.msra.mxu3 %v117_v39  ;;  %v107_v59 = vld [vmem:[#allocation10 + $0x18] sm:$0xff]  ;;  %v138_v60 = vld [vmem:[#allocation10 + $0x100] sm:$0xff]  ;;  %v139_v61 = vld [vmem:[#allocation10 + $0x108] sm:$0xff] }
  0x2c   :  { %180 = vmatpush.msra.mxu0 %v148_v40  ;;  %203 = vmatpush.msra.mxu1 %v149_v41  ;;  %v104_v62 = vld [vmem:[#allocation10] sm:$0xff]  ;;  %v105_v63 = vld [vmem:[#allocation10 + $0x8] sm:$0xff]  ;;  %v294_v0 = vld [vmem:[#allocation10 + $0x2f0] sm:$0xff] }
  0x2d   :  { %226 = vmatpush.msra.mxu2 %v114_v42  ;;  %249 = vmatpush.msra.mxu3 %v115_v43  ;;  %v295_v1 = vld [vmem:[#allocation10 + $0x2f8] sm:$0xff]  ;;  %v378_v2 = vld [vmem:[#allocation10 + $0x3f0] sm:$0xff]  ;;  %v292_v4 = vld [vmem:[#allocation10 + $0x2e0] sm:$0xff] }
  0x2e   :  { %181 = vmatpush.msra.mxu0 %v146_v44  ;;  %204 = vmatpush.msra.mxu1 %v147_v45  ;;  %v379_v3 = vld [vmem:[#allocation10 + $0x3f8] sm:$0xff]  ;;  %v293_v5 = vld [vmem:[#allocation10 + $0x2e8] sm:$0xff]  ;;  %v376_v6 = vld [vmem:[#allocation10 + $0x3e0] sm:$0xff] }
  0x2f   :  { %227 = vmatpush.msra.mxu2 %v112_v46  ;;  %250 = vmatpush.msra.mxu3 %v113_v47  ;;  %v377_v7 = vld [vmem:[#allocation10 + $0x3e8] sm:$0xff]  ;;  %v290_v8 = vld [vmem:[#allocation10 + $0x2d0] sm:$0xff]  ;;  %v291_v9 = vld [vmem:[#allocation10 + $0x2d8] sm:$0xff] }
  0x30   :  { %182 = vmatpush.msra.mxu0 %v144_v48  ;;  %205 = vmatpush.msra.mxu1 %v145_v49  ;;  %v374_v10 = vld [vmem:[#allocation10 + $0x3d0] sm:$0xff]  ;;  %v375_v11 = vld [vmem:[#allocation10 + $0x3d8] sm:$0xff]  ;;  %v288_v12 = vld [vmem:[#allocation10 + $0x2c0] sm:$0xff] }
  0x31   :  { %228 = vmatpush.msra.mxu2 %v110_v50  ;;  %251 = vmatpush.msra.mxu3 %v111_v51  ;;  %v289_v13 = vld [vmem:[#allocation10 + $0x2c8] sm:$0xff]  ;;  %v372_v14 = vld [vmem:[#allocation10 + $0x3c0] sm:$0xff]  ;;  %v286_v16 = vld [vmem:[#allocation10 + $0x2b0] sm:$0xff] }
  0x32   :  { %183 = vmatpush.msra.mxu0 %v142_v52  ;;  %206 = vmatpush.msra.mxu1 %v143_v53  ;;  %v373_v15 = vld [vmem:[#allocation10 + $0x3c8] sm:$0xff]  ;;  %v287_v17 = vld [vmem:[#allocation10 + $0x2b8] sm:$0xff]  ;;  %v370_v18 = vld [vmem:[#allocation10 + $0x3b0] sm:$0xff] }
  0x33   :  { %229 = vmatpush.msra.mxu2 %v108_v54  ;;  %252 = vmatpush.msra.mxu3 %v109_v55  ;;  %v371_v19 = vld [vmem:[#allocation10 + $0x3b8] sm:$0xff]  ;;  %v284_v20 = vld [vmem:[#allocation10 + $0x2a0] sm:$0xff]  ;;  %v285_v21 = vld [vmem:[#allocation10 + $0x2a8] sm:$0xff] }
  0x34   :  { %184 = vmatpush.msra.mxu0 %v140_v56  ;;  %207 = vmatpush.msra.mxu1 %v141_v57  ;;  %v368_v22 = vld [vmem:[#allocation10 + $0x3a0] sm:$0xff]  ;;  %v369_v23 = vld [vmem:[#allocation10 + $0x3a8] sm:$0xff]  ;;  %v282_v24 = vld [vmem:[#allocation10 + $0x290] sm:$0xff] }
  0x35   :  { %230 = vmatpush.msra.mxu2 %v106_v58  ;;  %253 = vmatpush.msra.mxu3 %v107_v59  ;;  %v283_v25 = vld [vmem:[#allocation10 + $0x298] sm:$0xff]  ;;  %v366_v26 = vld [vmem:[#allocation10 + $0x390] sm:$0xff]  ;;  %v102_v28 = vld [vmem:[#allocation2] sm:$0xff] }
  0x36   :  { %185 = vmatpush.msra.mxu0 %v138_v60  ;;  %208 = vmatpush.msra.mxu1 %v139_v61  ;;  %v367_v27 = vld [vmem:[#allocation10 + $0x398] sm:$0xff]  ;;  %v280_v29 = vld [vmem:[#allocation10 + $0x280] sm:$0xff]  ;;  %v281_v30 = vld [vmem:[#allocation10 + $0x288] sm:$0xff] }
  0x37   :  { %231 = vmatpush.msra.mxu2 %v104_v62  ;;  %254 = vmatpush.msra.mxu3 %v105_v63  ;;  %v364_v31 = vld [vmem:[#allocation10 + $0x380] sm:$0xff]  ;;  %v365_v32 = vld [vmem:[#allocation10 + $0x388] sm:$0xff]  ;;  %v136_v33 = vld [vmem:[#allocation5] sm:$0xff] }
  0x38   :  { %296 = vmatpush.msrb.mxu0 %v294_v0  ;;  %319 = vmatpush.msrb.mxu1 %v295_v1  ;;  %v278_v34 = vld [vmem:[#allocation10 + $0x270] sm:$0xff]  ;;  %v279_v35 = vld [vmem:[#allocation10 + $0x278] sm:$0xff]  ;;  %v276_v38 = vld [vmem:[#allocation10 + $0x260] sm:$0xff] }
  0x39   :  { %380 = vmatpush.msrb.mxu2 %v378_v2  ;;  %403 = vmatpush.msrb.mxu3 %v379_v3  ;;  %v362_v36 = vld [vmem:[#allocation10 + $0x370] sm:$0xff]  ;;  %v363_v37 = vld [vmem:[#allocation10 + $0x378] sm:$0xff]  ;;  %v277_v39 = vld [vmem:[#allocation10 + $0x268] sm:$0xff] }
  0x3a   :  { %297 = vmatpush.msrb.mxu0 %v292_v4  ;;  %320 = vmatpush.msrb.mxu1 %v293_v5  ;;  %v360_v40 = vld [vmem:[#allocation10 + $0x360] sm:$0xff]  ;;  %v361_v41 = vld [vmem:[#allocation10 + $0x368] sm:$0xff]  ;;  %v274_v42 = vld [vmem:[#allocation10 + $0x250] sm:$0xff] }
  0x3b   :  { %381 = vmatpush.msrb.mxu2 %v376_v6  ;;  %404 = vmatpush.msrb.mxu3 %v377_v7  ;;  %v275_v43 = vld [vmem:[#allocation10 + $0x258] sm:$0xff]  ;;  %v358_v44 = vld [vmem:[#allocation10 + $0x350] sm:$0xff]  ;;  %v103_v46 = vld [vmem:[#allocation2 + $0x8] sm:$0xff] }
  0x3c   :  { %298 = vmatpush.msrb.mxu0 %v290_v8  ;;  %321 = vmatpush.msrb.mxu1 %v291_v9  ;;  %v359_v45 = vld [vmem:[#allocation10 + $0x358] sm:$0xff]  ;;  %v272_v47 = vld [vmem:[#allocation10 + $0x240] sm:$0xff]  ;;  %v273_v48 = vld [vmem:[#allocation10 + $0x248] sm:$0xff] }
  0x3d   :  { %382 = vmatpush.msrb.mxu2 %v374_v10  ;;  %405 = vmatpush.msrb.mxu3 %v375_v11  ;;  %v356_v49 = vld [vmem:[#allocation10 + $0x340] sm:$0xff]  ;;  %v357_v50 = vld [vmem:[#allocation10 + $0x348] sm:$0xff]  ;;  %v137_v51 = vld [vmem:[#allocation5 + $0x8] sm:$0xff] }
  0x3e   :  { %299 = vmatpush.msrb.mxu0 %v288_v12  ;;  %322 = vmatpush.msrb.mxu1 %v289_v13  ;;  %v270_v52 = vld [vmem:[#allocation10 + $0x230] sm:$0xff]  ;;  %v271_v53 = vld [vmem:[#allocation10 + $0x238] sm:$0xff]  ;;  %v268_v56 = vld [vmem:[#allocation10 + $0x220] sm:$0xff] }
  0x3f   :  { %383 = vmatpush.msrb.mxu2 %v372_v14  ;;  %406 = vmatpush.msrb.mxu3 %v373_v15  ;;  %v354_v54 = vld [vmem:[#allocation10 + $0x330] sm:$0xff]  ;;  %v355_v55 = vld [vmem:[#allocation10 + $0x338] sm:$0xff]  ;;  %v269_v57 = vld [vmem:[#allocation10 + $0x228] sm:$0xff] }
  0x40   :  { %300 = vmatpush.msrb.mxu0 %v286_v16  ;;  %323 = vmatpush.msrb.mxu1 %v287_v17  ;;  %v352_v58 = vld [vmem:[#allocation10 + $0x320] sm:$0xff]  ;;  %v353_v59 = vld [vmem:[#allocation10 + $0x328] sm:$0xff]  ;;  %v266_v60 = vld [vmem:[#allocation10 + $0x210] sm:$0xff] }
  0x41   :  { %384 = vmatpush.msrb.mxu2 %v370_v18  ;;  %407 = vmatpush.msrb.mxu3 %v371_v19  ;;  %v267_v61 = vld [vmem:[#allocation10 + $0x218] sm:$0xff]  ;;  %v350_v62 = vld [vmem:[#allocation10 + $0x310] sm:$0xff]  ;;  %v264_v0 = vld [vmem:[#allocation10 + $0x200] sm:$0xff] }
  0x42   :  { %301 = vmatpush.msrb.mxu0 %v284_v20  ;;  %324 = vmatpush.msrb.mxu1 %v285_v21  ;;  %v351_v63 = vld [vmem:[#allocation10 + $0x318] sm:$0xff]  ;;  %v265_v1 = vld [vmem:[#allocation10 + $0x208] sm:$0xff]  ;;  %v348_v2 = vld [vmem:[#allocation10 + $0x300] sm:$0xff] }
  0x43   :  { %385 = vmatpush.msrb.mxu2 %v368_v22  ;;  %408 = vmatpush.msrb.mxu3 %v369_v23  ;;  %v349_v3 = vld [vmem:[#allocation10 + $0x308] sm:$0xff]  ;;  %v262_v4 = vld [vmem:[#allocation7] sm:$0xff]  ;;  %v346_v5 = vld [vmem:[#allocation8] sm:$0xff] }
  0x44   :  { %302 = vmatpush.msrb.mxu0 %v282_v24  ;;  %325 = vmatpush.msrb.mxu1 %v283_v25  ;;  %v263_v6 = vld [vmem:[#allocation7 + $0x8] sm:$0xff]  ;;  %v347_v7 = vld [vmem:[#allocation8 + $0x8] sm:$0xff]  ;;  %v430_v18 = vld [vmem:[%s708_s5] sm:$0x3]  ;;  %s640_s5 = smov [#allocation11]  }
  0x45   :  { %386 = vmatpush.msrb.mxu2 %v366_v26  ;;  %409 = vmatpush.msrb.mxu3 %v367_v27  ;;  %v432_v23 = vperm.slane %v430_v18, 0  ;;  %v433_v24 = vperm.slane %v430_v18, 1  ;;  %s452_s23 = sshll.u32 %s640_s5, 4  ;;  %s453_s23 = int_to_ptr.vmem [resolvable:$true] %s452_s23 }
  0x46   :  { %232 = vmatmul.f32.vlgmr.msra.gmra.mxu2 %v102_v28  ;;  %255 = vmatmul.f32.vlgmr.msra.gmra.mxu3 %v102_v28 }
  0x47   :  { %303 = vmatpush.msrb.mxu0 %v280_v29  ;;  %326 = vmatpush.msrb.mxu1 %v281_v30 }
  0x48   :  { %387 = vmatpush.msrb.mxu2 %v364_v31  ;;  %410 = vmatpush.msrb.mxu3 %v365_v32 }
  0x49   :  { %186 = vmatmul.f32.vlgmr.msra.gmra.mxu0 %v136_v33  ;;  %209 = vmatmul.f32.vlgmr.msra.gmra.mxu1 %v136_v33 }
  0x4a   :  { %304 = vmatpush.msrb.mxu0 %v278_v34  ;;  %327 = vmatpush.msrb.mxu1 %v279_v35 }
  0x4b   :  { %388 = vmatpush.msrb.mxu2 %v362_v36  ;;  %411 = vmatpush.msrb.mxu3 %v363_v37 }
  0x4c   :  { %305 = vmatpush.msrb.mxu0 %v276_v38  ;;  %328 = vmatpush.msrb.mxu1 %v277_v39 }
  0x4d   :  { %389 = vmatpush.msrb.mxu2 %v360_v40  ;;  %412 = vmatpush.msrb.mxu3 %v361_v41 }
  0x4e   :  { %306 = vmatpush.msrb.mxu0 %v274_v42  ;;  %329 = vmatpush.msrb.mxu1 %v275_v43 }
  0x4f   :  { %390 = vmatpush.msrb.mxu2 %v358_v44  ;;  %413 = vmatpush.msrb.mxu3 %v359_v45 }
  0x50   :  { %235 = vmatmul.f32.gmra.mxu2 %v103_v46  ;;  %258 = vmatmul.f32.gmra.mxu3 %v103_v46 }
  0x51   :  { %307 = vmatpush.msrb.mxu0 %v272_v47  ;;  %330 = vmatpush.msrb.mxu1 %v273_v48 }
  0x52   :  { %391 = vmatpush.msrb.mxu2 %v356_v49  ;;  %414 = vmatpush.msrb.mxu3 %v357_v50 }
  0x53   :  { %189 = vmatmul.f32.gmra.mxu0 %v137_v51  ;;  %212 = vmatmul.f32.gmra.mxu1 %v137_v51 }
  0x54   :  { %308 = vmatpush.msrb.mxu0 %v270_v52  ;;  %331 = vmatpush.msrb.mxu1 %v271_v53 }
  0x55   :  { %392 = vmatpush.msrb.mxu2 %v354_v54  ;;  %415 = vmatpush.msrb.mxu3 %v355_v55 }
  0x56   :  { %309 = vmatpush.msrb.mxu0 %v268_v56  ;;  %332 = vmatpush.msrb.mxu1 %v269_v57 }
  0x57   :  { %393 = vmatpush.msrb.mxu2 %v352_v58  ;;  %416 = vmatpush.msrb.mxu3 %v353_v59 }
  0x58   :  { %310 = vmatpush.msrb.mxu0 %v266_v60  ;;  %333 = vmatpush.msrb.mxu1 %v267_v61 }
  0x59   :  { %394 = vmatpush.msrb.mxu2 %v350_v62  ;;  %417 = vmatpush.msrb.mxu3 %v351_v63 }
  0x5a   :  { %311 = vmatpush.msrb.mxu0 %v264_v0  ;;  %334 = vmatpush.msrb.mxu1 %v265_v1 }
  0x5b   :  { %395 = vmatpush.msrb.mxu2 %v348_v2  ;;  %418 = vmatpush.msrb.mxu3 %v349_v3 }
  0x5c   :  { %312 = vmatmul.f32.vlgmr.msrb.gmra.mxu0 %v262_v4  ;;  %335 = vmatmul.f32.vlgmr.msrb.gmra.mxu1 %v262_v4 }
  0x5d   :  { %396 = vmatmul.f32.vlgmr.msrb.gmra.mxu2 %v346_v5  ;;  %419 = vmatmul.f32.vlgmr.msrb.gmra.mxu3 %v346_v5 }
  0x64   :  { %315 = vmatmul.f32.gmra.mxu0 %v263_v6  ;;  %338 = vmatmul.f32.gmra.mxu1 %v263_v6 }
  0x65   :  { %399 = vmatmul.f32.gmra.mxu2 %v347_v7  ;;  %422 = vmatmul.f32.gmra.mxu3 %v347_v7 }
  0xc6   :  { %v187_v8 = vpop.f32.mrf.mxu0  ;;  %v210_v9 = vpop.f32.mrf.mxu1 }
  0xc9   :  { %v233_v10 = vpop.f32.mrf.mxu2  ;;  %v256_v11 = vpop.f32.mrf.mxu3 }
  0xca   :  { %v234_v19 = vadd.f32 %v233_v10, %v187_v8  ;;  %v257_v20 = vadd.f32 %v256_v11, %v210_v9 }
  0xd0   :  { %v190_v12 = vpop.f32.mrf.mxu0  ;;  %v213_v13 = vpop.f32.mrf.mxu1 }
  0xd3   :  { %v236_v14 = vpop.f32.mrf.mxu2  ;;  %v259_v15 = vpop.f32.mrf.mxu3 }
  0xd4   :  { %v237_v33 = vadd.f32 %v236_v14, %v190_v12  ;;  %v260_v34 = vadd.f32 %v259_v15, %v213_v13 }
  0xd9   :  { %v313_v16 = vpop.f32.mrf.mxu0  ;;  %v336_v17 = vpop.f32.mrf.mxu1 }
  0xda   :  { %v342_v21 = vadd.f32 %v313_v16, %v234_v19  ;;  %v343_v22 = vadd.f32 %v336_v17, %v257_v20 }
  0xe0   :  { %v397_v25 = vpop.f32.mrf.mxu2  ;;  %v420_v26 = vpop.f32.mrf.mxu3 }
  0xe1   :  { %v426_v27 = vadd.f32 %v397_v25, %v342_v21  ;;  %v427_v28 = vadd.f32 %v420_v26, %v343_v22  ;;  %v316_v31 = vpop.f32.mrf.mxu0  ;;  %v339_v32 = vpop.f32.mrf.mxu1 }
  0xe2   :  { %v344_v37 = vadd.f32 %v316_v31, %v237_v33  ;;  %v345_v38 = vadd.f32 %v339_v32, %v260_v34 }
  0xe3   :  { %v436_v29 = vadd.f32 %v432_v23, %v426_v27  ;;  %v437_v30 = vadd.f32 %v433_v24, %v427_v28 }
  0xe5   :  { %v440_v35 = vmax.f32 %v436_v29, 0.0  ;;  %v441_v36 = vmax.f32 %v437_v30, 0.0 }
  0xe7   :  { %444 = vst [vmem:[#allocation11] sm:$0xff] %v440_v35 }
  0xe8   :  { %445 = vst [vmem:[#allocation11 + $0x8] sm:$0xff] %v441_v36  ;;  %v400_v39 = vpop.f32.mrf.mxu2  ;;  %v423_v40 = vpop.f32.mrf.mxu3 }
  0xe9   :  { %v428_v41 = vadd.f32 %v400_v39, %v344_v37  ;;  %v429_v42 = vadd.f32 %v423_v40, %v345_v38 }
  0xeb   :  { %v438_v43 = vadd.f32 %v432_v23, %v428_v41  ;;  %v439_v44 = vadd.f32 %v433_v24, %v429_v42 }
  0xed   :  { %v442_v45 = vmax.f32 %v438_v43, 0.0  ;;  %v443_v46 = vmax.f32 %v439_v44, 0.0 }
  0xef   :  { %446 = vst [vmem:[#allocation11 + $0x10] sm:$0xff] %v442_v45 }
  0xf0   :  { %447 = vst [vmem:[#allocation11 + $0x18] sm:$0xff] %v443_v46 }
  0xf1   :  { %460 = dma.vmem_to_hbm [thread:$0]  %s453_s23, 512, %s455_s26, [#allocation4], %s638_s21, %s638_s21, %s639_s22  }
  0xf2   :  { %629 = dma.done.wait [#allocation4], 512  }
  0xf3   :  { %630 = vsyncadd [#allocation4], 4294966784 }
  0xf4   :  { %465 = vsyncpa [#allocation3], 1 }
  0xf5   :  { %466 = vsyncpa [#allocation6], 1 }
  0xf6   :  { %467 = vsyncpa [#allocation9], 1 }
  0xf7   :  { %468 = vsyncpa [#allocation4], 1 }

</bundles_post_ra>
